<compile_context>
chip_gen: v6e
topology: v6e:2x2x1
jax: 0.10.0
libtpu: 0.0.40
codegen_flags: <defaults>
</compile_context>

<pallas_src>
import functools
import math

import jax
import jax.numpy as jnp
from jax.experimental import pallas as pl
from jax.experimental.pallas import tpu as pltpu


def _round_up(x, m):
    return ((x + m - 1) // m) * m


# ---------------------------------------------------------------------------
# Kernel 1: LayerNorm over the last dim.  Block = (TR, D) rows.
# ---------------------------------------------------------------------------
def _layer_norm_kernel(x_ref, g_ref, b_ref, o_ref, *, eps):
    x = x_ref[...].astype(jnp.float32)                       # (TR, D)
    mean = jnp.mean(x, axis=-1, keepdims=True)
    xc = x - mean
    var = jnp.mean(xc * xc, axis=-1, keepdims=True)          # biased, like torch
    inv = jax.lax.rsqrt(var + eps)                           # EUP
    y = xc * inv * g_ref[...] + b_ref[...]
    o_ref[...] = y.astype(o_ref.dtype)


# ---------------------------------------------------------------------------
# Kernel 2: fused LayerNorm + Linear (norm(x) @ W + b), one HBM read of x.
# ---------------------------------------------------------------------------
def _layer_norm_linear_kernel(x_ref, g_ref, b_ref, w_ref, wb_ref, o_ref, *, eps):
    x = x_ref[...].astype(jnp.float32)                       # (TR, D)
    mean = jnp.mean(x, axis=-1, keepdims=True)
    xc = x - mean
    var = jnp.mean(xc * xc, axis=-1, keepdims=True)
    y = xc * jax.lax.rsqrt(var + eps) * g_ref[...] + b_ref[...]
    acc = jnp.dot(y.astype(w_ref.dtype), w_ref[...],
                  preferred_element_type=jnp.float32)        # MXU, (TR, F)
    o_ref[...] = (acc + wb_ref[...]).astype(o_ref.dtype)


# ---------------------------------------------------------------------------
# Wrappers
# ---------------------------------------------------------------------------
def _flatten_rows(x):
    D = x.shape[-1]
    P = math.prod(x.shape[:-1]) if x.ndim > 1 else 1
    return x.reshape(P, D), P, D


def _row_tile(P):
    # Prefer big row tiles (per-grid-step overhead ~0.35us); keep them a
    # multiple of 8 for the sublane constraint and bounded for VMEM.
    return min(512, _round_up(P, 8))


def layer_norm(x, gamma, beta, *, eps=1e-5):
    """LayerNorm over the last dim of x (any leading shape)."""
    orig_shape = x.shape
    xf, P, D = _flatten_rows(x)
    TR = _row_tile(P)
    Pp = _round_up(P, TR)
    if Pp != P:
        xf = jnp.pad(xf, ((0, Pp - P), (0, 0)))
    g2 = gamma.reshape(1, D).astype(jnp.float32)
    b2 = beta.reshape(1, D).astype(jnp.float32)
    out = pl.pallas_call(
        functools.partial(_layer_norm_kernel, eps=eps),
        out_shape=jax.ShapeDtypeStruct((Pp, D), x.dtype),
        grid=(Pp // TR,),
        in_specs=[
            pl.BlockSpec((TR, D), lambda i: (i, 0)),
            pl.BlockSpec((1, D), lambda i: (0, 0)),
            pl.BlockSpec((1, D), lambda i: (0, 0)),
        ],
        out_specs=pl.BlockSpec((TR, D), lambda i: (i, 0)),
        compiler_params=pltpu.CompilerParams(
            dimension_semantics=("parallel",)),
    )(xf, g2, b2)
    return out[:P].reshape(orig_shape)


def pre_norm(x, gamma, beta, fn, *args, eps=1e-5, **kwargs):
    """Generic PreNorm: fn(LayerNorm(x), *args, **kwargs) for arbitrary fn."""
    # TODO(synk): arbitrary `fn` cannot be kernelized generically; it composes
    # as plain JAX on top of the Pallas LayerNorm.  Use pre_norm_linear for
    # the fused PreNorm(dim, Linear) fast path.
    return fn(layer_norm(x, gamma, beta, eps=eps), *args, **kwargs)


def pre_norm_linear(x, gamma, beta, w, b, *, eps=1e-5):
    """Fused PreNorm(dim, nn.Linear): (LayerNorm(x)) @ w + b in one kernel."""
    orig_shape = x.shape
    xf, P, D = _flatten_rows(x)
    F = w.shape[1]
    TR = _row_tile(P)
    Pp = _round_up(P, TR)
    if Pp != P:
        xf = jnp.pad(xf, ((0, Pp - P), (0, 0)))
    g2 = gamma.reshape(1, D).astype(jnp.float32)
    b2 = beta.reshape(1, D).astype(jnp.float32)
    wb2 = b.reshape(1, F).astype(jnp.float32)
    out = pl.pallas_call(
        functools.partial(_layer_norm_linear_kernel, eps=eps),
        out_shape=jax.ShapeDtypeStruct((Pp, F), x.dtype),
        grid=(Pp // TR,),
        in_specs=[
            pl.BlockSpec((TR, D), lambda i: (i, 0)),
            pl.BlockSpec((1, D), lambda i: (0, 0)),
            pl.BlockSpec((1, D), lambda i: (0, 0)),
            pl.BlockSpec((D, F), lambda i: (0, 0)),
            pl.BlockSpec((1, F), lambda i: (0, 0)),
        ],
        out_specs=pl.BlockSpec((TR, F), lambda i: (i, 0)),
        compiler_params=pltpu.CompilerParams(
            dimension_semantics=("parallel",)),
    )(xf, g2, b2, w, wb2)
    return out[:P].reshape(orig_shape[:-1] + (F,))


# ---------------------------------------------------------------------------
# Pure-JAX reference (matches torch nn.LayerNorm defaults: biased var, eps in sqrt)
# ---------------------------------------------------------------------------
def _ref_layer_norm(x, g, b, eps=1e-5):
    mean = jnp.mean(x, axis=-1, keepdims=True)
    var = jnp.mean(jnp.square(x - mean), axis=-1, keepdims=True)
    return (x - mean) / jnp.sqrt(var + eps) * g + b


if __name__ == "__main__":
    # Small shapes consistent with PreNorm over a (batch, seq, dim) tensor.
    B, S, D, F = 2, 16, 128, 256

    key = jax.random.PRNGKey(0)
    kx, kg, kb, kw, kwb = jax.random.split(key, 5)
    x = jax.random.normal(kx, (B, S, D), dtype=jnp.float32)
    gamma = 1.0 + 0.1 * jax.random.normal(kg, (D,), jnp.float32)
    beta = 0.1 * jax.random.normal(kb, (D,), jnp.float32)
    # The wrapped fn: a Linear(D -> F), the typical PreNorm(dim, fn) payload.
    w = 0.05 * jax.random.normal(kw, (D, F), jnp.float32)
    wb = 0.01 * jax.random.normal(kwb, (F,), jnp.float32)

    # 1) Generic composition: Pallas LayerNorm + arbitrary fn in plain JAX.
    fn = lambda y: y @ w + wb
    out_generic = jax.jit(lambda xx: pre_norm(xx, gamma, beta, fn))(x)
    out_generic = jax.block_until_ready(out_generic)

    # 2) Fused fast path: LayerNorm + Linear in one Pallas kernel.
    out_fused = jax.jit(lambda xx: pre_norm_linear(xx, gamma, beta, w, wb))(x)
    out_fused = jax.block_until_ready(out_fused)

    # Reference check.
    ref = _ref_layer_norm(x, gamma, beta) @ w + wb
    assert out_generic.shape == (B, S, F)
    assert out_fused.shape == (B, S, F)
    assert bool(jnp.all(jnp.isfinite(out_generic)))
    assert bool(jnp.all(jnp.isfinite(out_fused)))
    assert bool(jnp.allclose(out_generic, ref, atol=1e-4, rtol=1e-4))
    assert bool(jnp.allclose(out_fused, ref, atol=1e-4, rtol=1e-4))

    print("KERNEL_OK")
</pallas_src>

<mosaic_0001>
module attributes {stable_mosaic.version = 11 : i64} {
  func.func @_layer_norm_kernel(%arg0: i32, %arg1: memref<32x128xf32, #tpu.memory_space<vmem>>, %arg2: memref<1x128xf32, #tpu.memory_space<vmem>>, %arg3: memref<1x128xf32, #tpu.memory_space<vmem>>, %arg4: memref<32x128xf32, #tpu.memory_space<vmem>>) attributes {dimension_semantics = [#tpu.dimension_semantics<parallel>], iteration_bounds = array<i64: 1>, scalar_prefetch = 0 : i64, scratch_operands = 0 : i64, tpu.core_type = #tpu.core_type<tc>, window_params = [{transform_indices = @transform_0, window_bounds = array<i64: 32, 128>}, {pipeline_mode = #tpu.pipeline_mode<synchronous>, transform_indices = @transform_1, window_bounds = array<i64: 1, 128>}, {pipeline_mode = #tpu.pipeline_mode<synchronous>, transform_indices = @transform_2, window_bounds = array<i64: 1, 128>}, {transform_indices = @transform_3, window_bounds = array<i64: 32, 128>}]} {
    %c0 = arith.constant 0 : index
    %c0_0 = arith.constant 0 : index
    %0 = vector.load %arg1[%c0, %c0_0] : memref<32x128xf32, #tpu.memory_space<vmem>>, vector<32x128xf32>
    %cst = arith.constant dense<0.000000e+00> : vector<32xf32>
    %1 = vector.multi_reduction <add>, %0, %cst [1] : vector<32x128xf32> to vector<32xf32>
    %2 = vector.shape_cast %1 : vector<32xf32> to vector<32x1xf32>
    %cst_1 = arith.constant 1.280000e+02 : f32
    %3 = vector.broadcast %cst_1 : f32 to vector<32x1xf32>
    %4 = arith.divf %2, %3 : vector<32x1xf32>
    %5 = vector.broadcast %4 : vector<32x1xf32> to vector<32x128xf32>
    %6 = arith.subf %0, %5 : vector<32x128xf32>
    %7 = arith.mulf %6, %6 : vector<32x128xf32>
    %cst_2 = arith.constant dense<0.000000e+00> : vector<32xf32>
    %8 = vector.multi_reduction <add>, %7, %cst_2 [1] : vector<32x128xf32> to vector<32xf32>
    %9 = vector.shape_cast %8 : vector<32xf32> to vector<32x1xf32>
    %cst_3 = arith.constant 1.280000e+02 : f32
    %10 = vector.broadcast %cst_3 : f32 to vector<32x1xf32>
    %11 = arith.divf %9, %10 : vector<32x1xf32>
    %cst_4 = arith.constant 9.99999974E-6 : f32
    %12 = vector.broadcast %cst_4 : f32 to vector<32x1xf32>
    %13 = arith.addf %11, %12 : vector<32x1xf32>
    %14 = math.rsqrt %13 : vector<32x1xf32>
    %15 = vector.broadcast %14 : vector<32x1xf32> to vector<32x128xf32>
    %16 = arith.mulf %6, %15 : vector<32x128xf32>
    %c0_5 = arith.constant 0 : index
    %c0_6 = arith.constant 0 : index
    %17 = vector.load %arg2[%c0_5, %c0_6] : memref<1x128xf32, #tpu.memory_space<vmem>>, vector<1x128xf32>
    %18 = vector.broadcast %17 : vector<1x128xf32> to vector<32x128xf32>
    %19 = arith.mulf %16, %18 : vector<32x128xf32>
    %c0_7 = arith.constant 0 : index
    %c0_8 = arith.constant 0 : index
    %20 = vector.load %arg3[%c0_7, %c0_8] : memref<1x128xf32, #tpu.memory_space<vmem>>, vector<1x128xf32>
    %21 = vector.broadcast %20 : vector<1x128xf32> to vector<32x128xf32>
    %22 = arith.addf %19, %21 : vector<32x128xf32>
    %c0_9 = arith.constant 0 : index
    %c0_10 = arith.constant 0 : index
    %23 = vector.load %arg4[%c0_9, %c0_10] : memref<32x128xf32, #tpu.memory_space<vmem>>, vector<32x128xf32>
    tpu.vector_store %arg4[%c0_9, %c0_10], %22 {strides = array<i32>} : memref<32x128xf32, #tpu.memory_space<vmem>>, vector<32x128xf32>,
    return
  }
  func.func @transform_0(%arg0: i32) -> (i32, i32) {
    %c0_i32 = arith.constant 0 : i32
    %c0_i32_0 = arith.constant 0 : i32
    return %arg0, %c0_i32 : i32, i32
  }
  func.func @transform_1(%arg0: i32) -> (i32, i32) {
    %c0_i32 = arith.constant 0 : i32
    %c0_i32_0 = arith.constant 0 : i32
    %c0_i32_1 = arith.constant 0 : i32
    return %c0_i32, %c0_i32_0 : i32, i32
  }
  func.func @transform_2(%arg0: i32) -> (i32, i32) {
    %c0_i32 = arith.constant 0 : i32
    %c0_i32_0 = arith.constant 0 : i32
    %c0_i32_1 = arith.constant 0 : i32
    return %c0_i32, %c0_i32_0 : i32, i32
  }
  func.func @transform_3(%arg0: i32) -> (i32, i32) {
    %c0_i32 = arith.constant 0 : i32
    %c0_i32_0 = arith.constant 0 : i32
    return %arg0, %c0_i32 : i32, i32
  }
}

</mosaic_0001>

<bundles_post_ra>
// kernel: _lambda_.1
= control target key start
LH: loop header
LB: loop body
LE: loop exit
PB: predicated region body
PF: predicated region fallthrough
CT: control target
= control target key end

     0   :  { %8 = vsyncpa [#allocation3], 0  ;;  %s143_s12 = smov [#allocation2]   ;;  %s187_s0 = inlined_call_operand.hbm [shape: f32[32,128], index: 0, kind: input, shape index: {}]   ;;  %s188_s1 = inlined_call_operand.vmem [shape: f32[1,128], index: 1, kind: input, shape index: {}]   ;;  %s189_s2 = inlined_call_operand.vmem [shape: f32[1,128], index: 2, kind: input, shape index: {}]   ;;  %s190_s3 = inlined_call_operand.vmem [shape: f32[32,128], index: 3, kind: output, shape index: {}]  }
   0x1   :  { %s14_s13 = sshll.u32 %s143_s12, 4  ;;  %s15_s13 = int_to_ptr.vmem [resolvable:$true] %s14_s13 }
   0x2   :  { %s129_s14 = scalar_lea.vmem %s15_s13, 512  ;;  %p134_p1 = scmp.lt.s32.totalorder %s15_s13, %s15_s13 }
   0x3   :  { %p130_p0 = scmp.ne.s32.totalorder %s15_s13, %s129_s14  ;;  %p135_p2 = scmp.lt.s32.totalorder %s129_s14, %s129_s14 }
   0x5   :  { %p136_p3 = por %p135_p2, %p134_p1 }
   0x7   :  { %p137_p4 = pnand %p136_p3, %p130_p0 }
   0x9   :  { %140 = shalt.err (!%p137_p4)
}
   0xa   :  { %s144_s15 = smov 128   ;;  %s145_s16 = smov 8  }
   0xb   :  { %20 = dma.hbm_to_vmem [thread:$0]  %s187_s0, 512, %s15_s13, [#allocation3], %s144_s15, %s144_s15, %s145_s16  }
   0xc   :  { %141 = dma.done.wait [#allocation3], 512  }
   0xd   :  { %142 = vsyncadd [#allocation3], 4294966784  ;;  %v28_v0 = vld [vmem:[#allocation2] sm:$0xff]  ;;  %v30_v1 = vld [vmem:[#allocation2 + $0x10] sm:$0xff] }
   0xe   :  { %32 = vadd.xlane.f32.xlu0 %v28_v0  ;;  %36 = vadd.xlane.f32.xlu1 %v30_v1  ;;  %v29_v2 = vld [vmem:[#allocation2 + $0x8] sm:$0xff]  ;;  %v31_v3 = vld [vmem:[#allocation2 + $0x18] sm:$0xff]  ;;  %v108_v33 = vld [vmem:[%s188_s1] ss:$0 sm:$0xff] }
   0xf   :  { %v109_v35 = vld [vmem:[%s189_s2] ss:$0 sm:$0xff] }
  0x12   :  { %34 = vadd.xlane.f32.xlu0 %v29_v2  ;;  %38 = vadd.xlane.f32.xlu1 %v31_v3 }
  0x97   :  { %v33_v4 = vpop.xlane.xlu0 %32  ;;  %v37_v5 = vpop.xlane.xlu1 %36 }
  0x98   :  { %v41_v6 = vmul.f32 0.0078125, %v33_v4  ;;  %v43_v7 = vmul.f32 0.0078125, %v37_v5 }
  0x9a   :  { %v45_v8 = vsub.f32 %v28_v0, %v41_v6  ;;  %v47_v9 = vsub.f32 %v30_v1, %v43_v7 }
  0x9b   :  { %v35_v10 = vpop.xlane.xlu0 %34  ;;  %v39_v11 = vpop.xlane.xlu1 %38 }
  0x9c   :  { %v42_v12 = vmul.f32 0.0078125, %v35_v10  ;;  %v49_v13 = vmul.f32 %v45_v8, %v45_v8  ;;  %v44_v14 = vmul.f32 0.0078125, %v39_v11  ;;  %v51_v17 = vmul.f32 %v47_v9, %v47_v9 }
  0x9e   :  { %v46_v15 = vsub.f32 %v29_v2, %v42_v12  ;;  %53 = vadd.xlane.f32.xlu0 %v49_v13  ;;  %v48_v16 = vsub.f32 %v31_v3, %v44_v14 }
  0xa0   :  { %v50_v18 = vmul.f32 %v46_v15, %v46_v15  ;;  %v52_v19 = vmul.f32 %v48_v16, %v48_v16 }
  0xa2   :  { %57 = vadd.xlane.f32.xlu0 %v51_v17  ;;  %55 = vadd.xlane.f32.xlu1 %v50_v18 }
  0xa6   :  { %59 = vadd.xlane.f32.xlu1 %v52_v19 }
 0x127   :  { %v54_v20 = vpop.xlane.xlu0 %53 }
 0x128   :  { %v61_v21 = vmul.f32 0.0078125, %v54_v20 }
 0x12a   :  { %v65_v22 = vadd.f32 1e-05, %v61_v21 }
 0x12b   :  { %v56_v23 = vpop.xlane.xlu1 %55  ;;  %v58_v24 = vpop.xlane.xlu0 %57 }
 0x12c   :  { %113 = vrsqrt.f32 %v65_v22  ;;  %v62_v25 = vmul.f32 0.0078125, %v56_v23  ;;  %v63_v26 = vmul.f32 0.0078125, %v58_v24 }
 0x12e   :  { %v66_v27 = vadd.f32 1e-05, %v62_v25  ;;  %v67_v28 = vadd.f32 1e-05, %v63_v26 }
 0x12f   :  { %v60_v29 = vpop.xlane.xlu1 %59 }
 0x130   :  { %115 = vrsqrt.f32 %v66_v27  ;;  %v64_v30 = vmul.f32 0.0078125, %v60_v29 }
 0x131   :  { %117 = vrsqrt.f32 %v67_v28 }
 0x132   :  { %v68_v31 = vadd.f32 1e-05, %v64_v30 }
 0x134   :  { %119 = vrsqrt.f32 %v68_v31 }
 0x139   :  { %v114_v32 = vpop.eup %113 }
 0x13a   :  { %v73_v34 = vmul.f32 %v114_v32, %v45_v8 }
 0x13c   :  { %v84_v36 = vmul.f32 %v108_v33, %v73_v34 }
 0x13d   :  { %v116_v37 = vpop.eup %115 }
 0x13e   :  { %v118_v38 = vpop.eup %117  ;;  %v95_v39 = vadd.f32 %v109_v35, %v84_v36  ;;  %v74_v40 = vmul.f32 %v116_v37, %v46_v15 }
 0x13f   :  { %v75_v41 = vmul.f32 %v118_v38, %v47_v9 }
 0x140   :  { %99 = vst [vmem:[%s190_s3] sm:$0xff] %v95_v39  ;;  %v85_v42 = vmul.f32 %v108_v33, %v74_v40 }
 0x141   :  { %v120_v43 = vpop.eup %119  ;;  %v86_v44 = vmul.f32 %v108_v33, %v75_v41 }
 0x142   :  { %v96_v45 = vadd.f32 %v109_v35, %v85_v42  ;;  %v76_v46 = vmul.f32 %v120_v43, %v48_v16 }
 0x143   :  { %v97_v47 = vadd.f32 %v109_v35, %v86_v44 }
 0x144   :  { %100 = vst [vmem:[%s190_s3 + $0x8] sm:$0xff] %v96_v45  ;;  %v87_v48 = vmul.f32 %v108_v33, %v76_v46 }
 0x145   :  { %101 = vst [vmem:[%s190_s3 + $0x10] sm:$0xff] %v97_v47 }
 0x146   :  { %v98_v49 = vadd.f32 %v109_v35, %v87_v48 }
 0x148   :  { %102 = vst [vmem:[%s190_s3 + $0x18] sm:$0xff] %v98_v49 }
 0x149   :  { %107 = vsyncpa [#allocation3], 1 }

</bundles_post_ra>
